<compile_context>
chip_gen: v7x
topology: tpu7x:2x2x1
jax: 0.10.0
libtpu: 0.0.40
codegen_flags: <defaults>
</compile_context>

<pallas_src>
import functools

import jax
import jax.numpy as jnp
from jax.experimental import pallas as pl
from jax.experimental.pallas import tpu as pltpu


# ----------------------------- Pallas kernel ------------------------------ #
def _matmul_bias_act_kernel(x_ref, w_ref, b_ref, o_ref, *, apply_relu):
    acc = jnp.dot(x_ref[...], w_ref[...], preferred_element_type=jnp.float32)
    acc = acc + b_ref[...]                       # bias broadcast over rows
    if apply_relu:
        acc = jnp.maximum(acc, 0.0)
    o_ref[...] = acc.astype(o_ref.dtype)


def matmul_bias_act(x, w, b, *, relu):
    """out = act(x @ w + b).  x:(M,K) w:(K,N) b:(N,) -> (M,N) float32.

    Inputs are fed to the MXU in bf16 (half the HBM bytes, bf16 MXU rate) with f32
    accumulation.  At this model's shapes every GEMM is one full-extent block
    (M<=512, K<=576, N<=1024 -> a few hundred KB of VMEM), so the grid is a single
    step and extra buffering of the resident w/b operands is moot.  The tiled
    fallback (tm=512) keeps the double-buffered row tile well under the v5e 16 MiB
    / v7x 32 MiB scoped-VMEM defaults and lets the row grid shard across v7x's two
    TensorCores via dimension_semantics=("parallel",).
    """
    M, K = x.shape
    N = w.shape[1]
    xb = x.astype(jnp.bfloat16)
    wb = w.astype(jnp.bfloat16)
    bb = b.reshape(1, N).astype(jnp.float32)

    if M <= 1024:                       # always taken at this model's shapes
        tm, grid_m, Mp = M, 1, M
    else:                               # generic fallback: row-tiled GEMM
        tm = 512
        grid_m = pl.cdiv(M, tm)
        Mp = grid_m * tm
        if Mp != M:                     # tiny tail pad (K is small: Kq^2*Cin)
            xb = jnp.pad(xb, ((0, Mp - M), (0, 0)))

    kern = functools.partial(_matmul_bias_act_kernel, apply_relu=relu)
    out = pl.pallas_call(
        kern,
        out_shape=jax.ShapeDtypeStruct((Mp, N), jnp.float32),
        grid_spec=pltpu.PrefetchScalarGridSpec(
            num_scalar_prefetch=0,
            grid=(grid_m,),
            in_specs=[
                pl.BlockSpec((tm, K), lambda i: (i, 0)),
                pl.BlockSpec((K, N), lambda i: (0, 0)),
                pl.BlockSpec((1, N), lambda i: (0, 0)),
            ],
            out_specs=pl.BlockSpec((tm, N), lambda i: (i, 0)),
        ),
        compiler_params=pltpu.CompilerParams(dimension_semantics=("parallel",)),
    )(xb, wb, bb)
    return out[:M] if Mp != M else out


# --------------------------- ConvTranspose2d ------------------------------ #
def conv_transpose2d(a_nhwc, w_torch, b, *, stride, output_padding=0, relu,
                     out_nchw=False):
    """PyTorch-semantics ConvTranspose2d (padding=0) via sub-pixel decomposition.

    a_nhwc:  (B, Hin, Win, Cin) activated input
    w_torch: (Cin, Cout, K, K)  PyTorch ConvTranspose2d weight layout
    Requires K % stride == 0 (true for every layer of this model).

    out[b, s*q+ry, s*p+rx, co] = sum_{my,mx,ci} a[b, q-my, p-mx, ci]
                                               * W[ci, co, ry+s*my, rx+s*mx] + bias[co]
    which is a single GEMM with reduction Kq^2*Cin and output columns (ry, rx, co);
    bias + activation are fused into the Pallas kernel (legal because the
    depth-to-space epilogue is a pure permutation of elements).
    """
    B, Hin, Win, Cin = a_nhwc.shape
    Cout, K = w_torch.shape[1], w_torch.shape[2]
    s = stride
    Kq = K // s
    Q, P = Hin + Kq - 1, Win + Kq - 1
    Hout = (Hin - 1) * s + K + output_padding
    Wout = (Win - 1) * s + K + output_padding

    # im2col over the Kq x Kq sub-kernel taps (tiny input, no zero-stuffing).
    pad = Kq - 1
    ap = jnp.pad(a_nhwc, ((0, 0), (pad, pad), (pad, pad), (0, 0)))
    cols = [ap[:, jy:jy + Q, jx:jx + P, :] for jy in range(Kq) for jx in range(Kq)]
    patches = jnp.stack(cols, axis=3).reshape(B * Q * P, Kq * Kq * Cin)

    # Weight -> (Kq*Kq*Cin, s*s*Cout):  split K into (my, ry), flip taps (j = Kq-1-m).
    w6 = w_torch.reshape(Cin, Cout, Kq, s, Kq, s)[:, :, ::-1, :, ::-1, :]
    wmat = jnp.transpose(w6, (2, 4, 0, 3, 5, 1)).reshape(Kq * Kq * Cin, s * s * Cout)
    bvec = jnp.tile(b, s * s)           # bias per output column (ry, rx, co)

    o = matmul_bias_act(patches, wmat, bvec, relu=relu)        # Pallas GEMM hot path
    o = o.reshape(B, Q, P, s, s, Cout)

    # Depth-to-space (pure layout).  For the final layer emit NCHW directly so no
    # extra NHWC->NCHW pass is needed after the last GEMM.
    if out_nchw:
        out = jnp.transpose(o, (0, 5, 1, 3, 2, 4)).reshape(B, Cout, s * Q, s * P)
    else:
        out = jnp.transpose(o, (0, 1, 3, 2, 4, 5)).reshape(B, s * Q, s * P, Cout)

    if s * Q != Hout or s * P != Wout:  # output_padding strip: bias-only rows/cols
        fill = jnp.maximum(b, 0.0) if relu else b
        if out_nchw:
            base = jnp.broadcast_to(fill.reshape(1, Cout, 1, 1).astype(out.dtype),
                                    (B, Cout, Hout, Wout))
            out = base.at[:, :, :s * Q, :s * P].set(out)
        else:
            base = jnp.broadcast_to(fill.reshape(1, 1, 1, Cout).astype(out.dtype),
                                    (B, Hout, Wout, Cout))
            out = base.at[:, :s * Q, :s * P, :].set(out)
    return out


# ------------------------------ full model -------------------------------- #
@jax.jit
def transpose_cnn_forward(x, params):
    """x: (B, input_dim) float32  ->  (B, output_chn, 64, 64) float32 (NCHW)."""
    B = x.shape[0]
    h = matmul_bias_act(x, params["w_lin"], params["b_lin"], relu=True)    # (B,1024)
    h = h.reshape(B, 64, 4, 4).transpose(0, 2, 3, 1)                       # NCHW->NHWC
    h = conv_transpose2d(h, params["w1"], params["b1"], stride=1, relu=True)      # (B,6,6,64)
    h = conv_transpose2d(h, params["w2"], params["b2"], stride=2,
                         output_padding=1, relu=True)                             # (B,15,15,32)
    h = conv_transpose2d(h, params["w3"], params["b3"], stride=4, relu=False,
                         out_nchw=True)                                           # (B,C,64,64)
    return h


# ------------------------- pure-JAX reference ------------------------------ #
def reference_forward(x, params):
    h = jnp.maximum(x @ params["w_lin"] + params["b_lin"], 0.0)
    h = h.reshape(x.shape[0], 64, 4, 4)  # NCHW

    def convT(h, w, b, s, op, relu):
        K = w.shape[2]
        rhs = jnp.transpose(w, (1, 0, 2, 3))[:, :, ::-1, ::-1]  # OIHW, flipped
        out = jax.lax.conv_general_dilated(
            h, rhs, window_strides=(1, 1),
            padding=[(K - 1, K - 1 + op), (K - 1, K - 1 + op)],
            lhs_dilation=(s, s),
            dimension_numbers=("NCHW", "OIHW", "NCHW"))
        out = out + b.reshape(1, -1, 1, 1)
        return jnp.maximum(out, 0.0) if relu else out

    h = convT(h, params["w1"], params["b1"], 1, 0, True)
    h = convT(h, params["w2"], params["b2"], 2, 1, True)
    h = convT(h, params["w3"], params["b3"], 4, 0, False)
    return h


def init_params(key, input_dim, output_chn):
    ks = jax.random.split(key, 4)

    def he(k, shape, fan_in):
        return (jax.random.normal(k, shape, jnp.float32) * (2.0 / fan_in) ** 0.5)

    return {
        "w_lin": he(ks[0], (input_dim, 64 * 4 * 4), input_dim),
        "b_lin": jnp.zeros((64 * 4 * 4,), jnp.float32),
        "w1": he(ks[1], (64, 64, 3, 3), 64 * 3 * 3),            # ConvT weight (Cin,Cout,K,K)
        "b1": jnp.zeros((64,), jnp.float32),
        "w2": he(ks[2], (64, 32, 4, 4), 64 * 4 * 4),
        "b2": jnp.zeros((32,), jnp.float32),
        "w3": he(ks[3], (32, output_chn, 8, 8), 32 * 8 * 8),
        "b3": jnp.zeros((output_chn,), jnp.float32),
    }


if __name__ == "__main__":
    INPUT_DIM = 32
    OUTPUT_CHN = 4
    BATCH = 2

    root = jax.random.PRNGKey(0)
    k_param, k_x = jax.random.split(root)
    params = init_params(k_param, INPUT_DIM, OUTPUT_CHN)
    x = jax.random.normal(k_x, (BATCH, INPUT_DIM), jnp.float32)

    out = jax.block_until_ready(transpose_cnn_forward(x, params))
    assert out.shape == (BATCH, OUTPUT_CHN, 64, 64), out.shape
    assert jnp.all(jnp.isfinite(out))

    ref = jax.block_until_ready(reference_forward(x, params))
    err = float(jnp.max(jnp.abs(out - ref)))
    scale = float(jnp.max(jnp.abs(ref))) + 1e-6
    assert err / scale < 3e-2, (err, scale)

    print("KERNEL_OK")
</pallas_src>

<mosaic_0001>
module attributes {stable_mosaic.version = 11 : i64} {
  func.func @_matmul_bias_act_kernel(%arg0: i32, %arg1: memref<2x32xbf16, #tpu.memory_space<vmem>>, %arg2: memref<32x1024xbf16, #tpu.memory_space<vmem>>, %arg3: memref<1x1024xf32, #tpu.memory_space<vmem>>, %arg4: memref<2x1024xf32, #tpu.memory_space<vmem>>) attributes {dimension_semantics = [#tpu.dimension_semantics<parallel>], iteration_bounds = array<i64: 1>, scalar_prefetch = 0 : i64, scratch_operands = 0 : i64, tpu.core_type = #tpu.core_type<tc>, window_params = [{transform_indices = @transform_0, window_bounds = array<i64: 2, 32>}, {pipeline_mode = #tpu.pipeline_mode<synchronous>, transform_indices = @transform_1, window_bounds = array<i64: 32, 1024>}, {pipeline_mode = #tpu.pipeline_mode<synchronous>, transform_indices = @transform_2, window_bounds = array<i64: 1, 1024>}, {transform_indices = @transform_3, window_bounds = array<i64: 2, 1024>}]} {
    %c0 = arith.constant 0 : index
    %c0_0 = arith.constant 0 : index
    %0 = vector.load %arg1[%c0, %c0_0] : memref<2x32xbf16, #tpu.memory_space<vmem>>, vector<2x32xbf16>
    %c0_1 = arith.constant 0 : index
    %c0_2 = arith.constant 0 : index
    %1 = vector.load %arg2[%c0_1, %c0_2] : memref<32x1024xbf16, #tpu.memory_space<vmem>>, vector<32x1024xbf16>
    %cst = arith.constant dense<0.000000e+00> : vector<2x1024xf32>
    %2 = tpu.matmul %0, %1, %cst {dimension_numbers = #tpu.dot_dimension_numbers<[1], [0], [0], [1], [0, 0, 1, 1], [], []>} : vector<2x32xbf16>, vector<32x1024xbf16>, vector<2x1024xf32> -> vector<2x1024xf32>
    %c0_3 = arith.constant 0 : index
    %c0_4 = arith.constant 0 : index
    %3 = vector.load %arg3[%c0_3, %c0_4] : memref<1x1024xf32, #tpu.memory_space<vmem>>, vector<1x1024xf32>
    %4 = vector.broadcast %3 : vector<1x1024xf32> to vector<2x1024xf32>
    %5 = arith.addf %2, %4 : vector<2x1024xf32>
    %cst_5 = arith.constant 0.000000e+00 : f32
    %6 = vector.broadcast %cst_5 : f32 to vector<2x1024xf32>
    %7 = arith.maximumf %5, %6 : vector<2x1024xf32>
    %c0_6 = arith.constant 0 : index
    %c0_7 = arith.constant 0 : index
    %8 = vector.load %arg4[%c0_6, %c0_7] : memref<2x1024xf32, #tpu.memory_space<vmem>>, vector<2x1024xf32>
    tpu.vector_store %arg4[%c0_6, %c0_7], %7 {strides = array<i32>} : memref<2x1024xf32, #tpu.memory_space<vmem>>, vector<2x1024xf32>,
    return
  }
  func.func @transform_0(%arg0: i32) -> (i32, i32) {
    %c0_i32 = arith.constant 0 : i32
    %c0_i32_0 = arith.constant 0 : i32
    return %arg0, %c0_i32 : i32, i32
  }
  func.func @transform_1(%arg0: i32) -> (i32, i32) {
    %c0_i32 = arith.constant 0 : i32
    %c0_i32_0 = arith.constant 0 : i32
    %c0_i32_1 = arith.constant 0 : i32
    return %c0_i32, %c0_i32_0 : i32, i32
  }
  func.func @transform_2(%arg0: i32) -> (i32, i32) {
    %c0_i32 = arith.constant 0 : i32
    %c0_i32_0 = arith.constant 0 : i32
    %c0_i32_1 = arith.constant 0 : i32
    return %c0_i32, %c0_i32_0 : i32, i32
  }
  func.func @transform_3(%arg0: i32) -> (i32, i32) {
    %c0_i32 = arith.constant 0 : i32
    %c0_i32_0 = arith.constant 0 : i32
    return %arg0, %c0_i32 : i32, i32
  }
}

module attributes {stable_mosaic.version = 11 : i64} {
  func.func @_matmul_bias_act_kernel(%arg0: i32, %arg1: memref<72x576xbf16, #tpu.memory_space<vmem>>, %arg2: memref<576x64xbf16, #tpu.memory_space<vmem>>, %arg3: memref<1x64xf32, #tpu.memory_space<vmem>>, %arg4: memref<72x64xf32, #tpu.memory_space<vmem>>) attributes {dimension_semantics = [#tpu.dimension_semantics<parallel>], iteration_bounds = array<i64: 1>, scalar_prefetch = 0 : i64, scratch_operands = 0 : i64, tpu.core_type = #tpu.core_type<tc>, window_params = [{transform_indices = @transform_0, window_bounds = array<i64: 72, 576>}, {pipeline_mode = #tpu.pipeline_mode<synchronous>, transform_indices = @transform_1, window_bounds = array<i64: 576, 64>}, {pipeline_mode = #tpu.pipeline_mode<synchronous>, transform_indices = @transform_2, window_bounds = array<i64: 1, 64>}, {transform_indices = @transform_3, window_bounds = array<i64: 72, 64>}]} {
    %c0 = arith.constant 0 : index
    %c0_0 = arith.constant 0 : index
    %0 = vector.load %arg1[%c0, %c0_0] : memref<72x576xbf16, #tpu.memory_space<vmem>>, vector<72x576xbf16>
    %c0_1 = arith.constant 0 : index
    %c0_2 = arith.constant 0 : index
    %1 = vector.load %arg2[%c0_1, %c0_2] : memref<576x64xbf16, #tpu.memory_space<vmem>>, vector<576x64xbf16>
    %cst = arith.constant dense<0.000000e+00> : vector<72x64xf32>
    %2 = tpu.matmul %0, %1, %cst {dimension_numbers = #tpu.dot_dimension_numbers<[1], [0], [0], [1], [0, 0, 1, 1], [], []>} : vector<72x576xbf16>, vector<576x64xbf16>, vector<72x64xf32> -> vector<72x64xf32>
    %c0_3 = arith.constant 0 : index
    %c0_4 = arith.constant 0 : index
    %3 = vector.load %arg3[%c0_3, %c0_4] : memref<1x64xf32, #tpu.memory_space<vmem>>, vector<1x64xf32>
    %4 = vector.broadcast %3 : vector<1x64xf32> to vector<72x64xf32>
    %5 = arith.addf %2, %4 : vector<72x64xf32>
    %cst_5 = arith.constant 0.000000e+00 : f32
    %6 = vector.broadcast %cst_5 : f32 to vector<72x64xf32>
    %7 = arith.maximumf %5, %6 : vector<72x64xf32>
    %c0_6 = arith.constant 0 : index
    %c0_7 = arith.constant 0 : index
    %8 = vector.load %arg4[%c0_6, %c0_7] : memref<72x64xf32, #tpu.memory_space<vmem>>, vector<72x64xf32>
    tpu.vector_store %arg4[%c0_6, %c0_7], %7 {strides = array<i32>} : memref<72x64xf32, #tpu.memory_space<vmem>>, vector<72x64xf32>,
    return
  }
  func.func @transform_0(%arg0: i32) -> (i32, i32) {
    %c0_i32 = arith.constant 0 : i32
    %c0_i32_0 = arith.constant 0 : i32
    return %arg0, %c0_i32 : i32, i32
  }
  func.func @transform_1(%arg0: i32) -> (i32, i32) {
    %c0_i32 = arith.constant 0 : i32
    %c0_i32_0 = arith.constant 0 : i32
    %c0_i32_1 = arith.constant 0 : i32
    return %c0_i32, %c0_i32_0 : i32, i32
  }
  func.func @transform_2(%arg0: i32) -> (i32, i32) {
    %c0_i32 = arith.constant 0 : i32
    %c0_i32_0 = arith.constant 0 : i32
    %c0_i32_1 = arith.constant 0 : i32
    return %c0_i32, %c0_i32_0 : i32, i32
  }
  func.func @transform_3(%arg0: i32) -> (i32, i32) {
    %c0_i32 = arith.constant 0 : i32
    %c0_i32_0 = arith.constant 0 : i32
    return %arg0, %c0_i32 : i32, i32
  }
}

module attributes {stable_mosaic.version = 11 : i64} {
  func.func @_matmul_bias_act_kernel(%arg0: i32, %arg1: memref<98x256xbf16, #tpu.memory_space<vmem>>, %arg2: memref<256x128xbf16, #tpu.memory_space<vmem>>, %arg3: memref<1x128xf32, #tpu.memory_space<vmem>>, %arg4: memref<98x128xf32, #tpu.memory_space<vmem>>) attributes {dimension_semantics = [#tpu.dimension_semantics<parallel>], iteration_bounds = array<i64: 1>, scalar_prefetch = 0 : i64, scratch_operands = 0 : i64, tpu.core_type = #tpu.core_type<tc>, window_params = [{transform_indices = @transform_0, window_bounds = array<i64: 98, 256>}, {pipeline_mode = #tpu.pipeline_mode<synchronous>, transform_indices = @transform_1, window_bounds = array<i64: 256, 128>}, {pipeline_mode = #tpu.pipeline_mode<synchronous>, transform_indices = @transform_2, window_bounds = array<i64: 1, 128>}, {transform_indices = @transform_3, window_bounds = array<i64: 98, 128>}]} {
    %c0 = arith.constant 0 : index
    %c0_0 = arith.constant 0 : index
    %0 = vector.load %arg1[%c0, %c0_0] : memref<98x256xbf16, #tpu.memory_space<vmem>>, vector<98x256xbf16>
    %c0_1 = arith.constant 0 : index
    %c0_2 = arith.constant 0 : index
    %1 = vector.load %arg2[%c0_1, %c0_2] : memref<256x128xbf16, #tpu.memory_space<vmem>>, vector<256x128xbf16>
    %cst = arith.constant dense<0.000000e+00> : vector<98x128xf32>
    %2 = tpu.matmul %0, %1, %cst {dimension_numbers = #tpu.dot_dimension_numbers<[1], [0], [0], [1], [0, 0, 1, 1], [], []>} : vector<98x256xbf16>, vector<256x128xbf16>, vector<98x128xf32> -> vector<98x128xf32>
    %c0_3 = arith.constant 0 : index
    %c0_4 = arith.constant 0 : index
    %3 = vector.load %arg3[%c0_3, %c0_4] : memref<1x128xf32, #tpu.memory_space<vmem>>, vector<1x128xf32>
    %4 = vector.broadcast %3 : vector<1x128xf32> to vector<98x128xf32>
    %5 = arith.addf %2, %4 : vector<98x128xf32>
    %cst_5 = arith.constant 0.000000e+00 : f32
    %6 = vector.broadcast %cst_5 : f32 to vector<98x128xf32>
    %7 = arith.maximumf %5, %6 : vector<98x128xf32>
    %c0_6 = arith.constant 0 : index
    %c0_7 = arith.constant 0 : index
    %8 = vector.load %arg4[%c0_6, %c0_7] : memref<98x128xf32, #tpu.memory_space<vmem>>, vector<98x128xf32>
    tpu.vector_store %arg4[%c0_6, %c0_7], %7 {strides = array<i32>} : memref<98x128xf32, #tpu.memory_space<vmem>>, vector<98x128xf32>,
    return
  }
  func.func @transform_0(%arg0: i32) -> (i32, i32) {
    %c0_i32 = arith.constant 0 : i32
    %c0_i32_0 = arith.constant 0 : i32
    return %arg0, %c0_i32 : i32, i32
  }
  func.func @transform_1(%arg0: i32) -> (i32, i32) {
    %c0_i32 = arith.constant 0 : i32
    %c0_i32_0 = arith.constant 0 : i32
    %c0_i32_1 = arith.constant 0 : i32
    return %c0_i32, %c0_i32_0 : i32, i32
  }
  func.func @transform_2(%arg0: i32) -> (i32, i32) {
    %c0_i32 = arith.constant 0 : i32
    %c0_i32_0 = arith.constant 0 : i32
    %c0_i32_1 = arith.constant 0 : i32
    return %c0_i32, %c0_i32_0 : i32, i32
  }
  func.func @transform_3(%arg0: i32) -> (i32, i32) {
    %c0_i32 = arith.constant 0 : i32
    %c0_i32_0 = arith.constant 0 : i32
    return %arg0, %c0_i32 : i32, i32
  }
}

module attributes {stable_mosaic.version = 11 : i64} {
  func.func @_matmul_bias_act_kernel(%arg0: i32, %arg1: memref<512x128xbf16, #tpu.memory_space<vmem>>, %arg2: memref<128x64xbf16, #tpu.memory_space<vmem>>, %arg3: memref<1x64xf32, #tpu.memory_space<vmem>>, %arg4: memref<512x64xf32, #tpu.memory_space<vmem>>) attributes {dimension_semantics = [#tpu.dimension_semantics<parallel>], iteration_bounds = array<i64: 1>, scalar_prefetch = 0 : i64, scratch_operands = 0 : i64, tpu.core_type = #tpu.core_type<tc>, window_params = [{transform_indices = @transform_0, window_bounds = array<i64: 512, 128>}, {pipeline_mode = #tpu.pipeline_mode<synchronous>, transform_indices = @transform_1, window_bounds = array<i64: 128, 64>}, {pipeline_mode = #tpu.pipeline_mode<synchronous>, transform_indices = @transform_2, window_bounds = array<i64: 1, 64>}, {transform_indices = @transform_3, window_bounds = array<i64: 512, 64>}]} {
    %c0 = arith.constant 0 : index
    %c0_0 = arith.constant 0 : index
    %0 = vector.load %arg1[%c0, %c0_0] : memref<512x128xbf16, #tpu.memory_space<vmem>>, vector<512x128xbf16>
    %c0_1 = arith.constant 0 : index
    %c0_2 = arith.constant 0 : index
    %1 = vector.load %arg2[%c0_1, %c0_2] : memref<128x64xbf16, #tpu.memory_space<vmem>>, vector<128x64xbf16>
    %cst = arith.constant dense<0.000000e+00> : vector<512x64xf32>
    %2 = tpu.matmul %0, %1, %cst {dimension_numbers = #tpu.dot_dimension_numbers<[1], [0], [0], [1], [0, 0, 1, 1], [], []>} : vector<512x128xbf16>, vector<128x64xbf16>, vector<512x64xf32> -> vector<512x64xf32>
    %c0_3 = arith.constant 0 : index
    %c0_4 = arith.constant 0 : index
    %3 = vector.load %arg3[%c0_3, %c0_4] : memref<1x64xf32, #tpu.memory_space<vmem>>, vector<1x64xf32>
    %4 = vector.broadcast %3 : vector<1x64xf32> to vector<512x64xf32>
    %5 = arith.addf %2, %4 : vector<512x64xf32>
    %c0_5 = arith.constant 0 : index
    %c0_6 = arith.constant 0 : index
    %6 = vector.load %arg4[%c0_5, %c0_6] : memref<512x64xf32, #tpu.memory_space<vmem>>, vector<512x64xf32>
    tpu.vector_store %arg4[%c0_5, %c0_6], %5 {strides = array<i32>} : memref<512x64xf32, #tpu.memory_space<vmem>>, vector<512x64xf32>,
    return
  }
  func.func @transform_0(%arg0: i32) -> (i32, i32) {
    %c0_i32 = arith.constant 0 : i32
    %c0_i32_0 = arith.constant 0 : i32
    return %arg0, %c0_i32 : i32, i32
  }
  func.func @transform_1(%arg0: i32) -> (i32, i32) {
    %c0_i32 = arith.constant 0 : i32
    %c0_i32_0 = arith.constant 0 : i32
    %c0_i32_1 = arith.constant 0 : i32
    return %c0_i32, %c0_i32_0 : i32, i32
  }
  func.func @transform_2(%arg0: i32) -> (i32, i32) {
    %c0_i32 = arith.constant 0 : i32
    %c0_i32_0 = arith.constant 0 : i32
    %c0_i32_1 = arith.constant 0 : i32
    return %c0_i32, %c0_i32_0 : i32, i32
  }
  func.func @transform_3(%arg0: i32) -> (i32, i32) {
    %c0_i32 = arith.constant 0 : i32
    %c0_i32_0 = arith.constant 0 : i32
    return %arg0, %c0_i32 : i32, i32
  }
}

</mosaic_0001>

<bundles_post_ra>
// kernel: reverse.2
= control target key start
LH: loop header
LB: loop body
LE: loop exit
PB: predicated region body
PF: predicated region fallthrough
CT: control target
= control target key end

     0   :  { %v503_v3 = vmov 0.0   ;;  %s1018_s0 = inlined_call_operand.vmem [shape: f32[64,64,3,3], index: 0, kind: input, shape index: {}]   ;;  %s1019_s1 = inlined_call_operand.vmem [shape: bf16[64,64,3,3], index: 1, kind: output, shape index: {}]  }
   0x1   :  { %v360_v0 = vld [vmem:[%s1018_s0 + $0x200] sm:$0xff]  ;;  %v376_v19 = vld [vmem:[%s1018_s0 + $0x208] sm:$0xff]  ;;  %v394_v37 = vld [vmem:[%s1018_s0 + $0x210] sm:$0xff] }
   0x2   :  { %v361_v1 = vld [vmem:[%s1018_s0 + $0x140] sm:$0xff]  ;;  %v4_v4 = vpack.c.bf16 %v503_v3, %v360_v0  ;;  %v378_v20 = vld [vmem:[%s1018_s0 + $0x148] sm:$0xff]  ;;  %v48_v22 = vpack.c.bf16 %v503_v3, %v376_v19  ;;  %v396_v38 = vld [vmem:[%s1018_s0 + $0x150] sm:$0xff]  ;;  %v93_v40 = vpack.c.bf16 %v503_v3, %v394_v37 }
   0x3   :  { %v363_v2 = vld [vmem:[%s1018_s0 + $0x80] sm:$0xff]  ;;  %v9_v5 = vpack.c.bf16 %v503_v3, %v361_v1  ;;  %v380_v21 = vld [vmem:[%s1018_s0 + $0x88] sm:$0xff]  ;;  %v53_v23 = vpack.c.bf16 %v503_v3, %v378_v20  ;;  %v398_v39 = vld [vmem:[%s1018_s0 + $0x90] sm:$0xff]  ;;  %v98_v41 = vpack.c.bf16 %v503_v3, %v396_v38 }
   0x4   :  { %v14_v6 = vpack.c.bf16 %v503_v3, %v363_v2  ;;  %v365_v7 = vld [vmem:[%s1018_s0 + $0x1c0] sm:$0xff]  ;;  %5 = vst [vmem:[%s1019_s1] sm:$0xf] %v4_v4  ;;  %v58_v24 = vpack.c.bf16 %v503_v3, %v380_v21  ;;  %v382_v25 = vld [vmem:[%s1018_s0 + $0x1c8] sm:$0xff]  ;;  %377 = vst [vmem:[%s1019_s1 + $0x4] sm:$0xf] %v48_v22  ;;  %v103_v42 = vpack.c.bf16 %v503_v3, %v398_v39 }
   0x5   :  { %v367_v8 = vld [vmem:[%s1018_s0 + $0x100] sm:$0xff]  ;;  %v19_v10 = vpack.c.bf16 %v503_v3, %v365_v7  ;;  %362 = vst [vmem:[%s1019_s1 + $0x60] sm:$0xf] %v9_v5  ;;  %v384_v26 = vld [vmem:[%s1018_s0 + $0x108] sm:$0xff]  ;;  %v63_v28 = vpack.c.bf16 %v503_v3, %v382_v25  ;;  %379 = vst [vmem:[%s1019_s1 + $0x64] sm:$0xf] %v53_v23 }
   0x6   :  { %v369_v9 = vld [vmem:[%s1018_s0 + $0x40] sm:$0xff]  ;;  %v24_v11 = vpack.c.bf16 %v503_v3, %v367_v8  ;;  %364 = vst [vmem:[%s1019_s1 + $0xc0] sm:$0xf] %v14_v6  ;;  %v386_v27 = vld [vmem:[%s1018_s0 + $0x48] sm:$0xff]  ;;  %v68_v29 = vpack.c.bf16 %v503_v3, %v384_v26  ;;  %381 = vst [vmem:[%s1019_s1 + $0xc4] sm:$0xf] %v58_v24 }
   0x7   :  { %v29_v12 = vpack.c.bf16 %v503_v3, %v369_v9  ;;  %v371_v13 = vld [vmem:[%s1018_s0 + $0x180] sm:$0xff]  ;;  %366 = vst [vmem:[%s1019_s1 + $0x20] sm:$0xf] %v19_v10  ;;  %v73_v30 = vpack.c.bf16 %v503_v3, %v386_v27  ;;  %v388_v31 = vld [vmem:[%s1018_s0 + $0x188] sm:$0xff]  ;;  %383 = vst [vmem:[%s1019_s1 + $0x24] sm:$0xf] %v63_v28 }
   0x8   :  { %v373_v14 = vld [vmem:[%s1018_s0 + $0xc0] sm:$0xff]  ;;  %v34_v16 = vpack.c.bf16 %v503_v3, %v371_v13  ;;  %368 = vst [vmem:[%s1019_s1 + $0x80] sm:$0xf] %v24_v11  ;;  %v390_v32 = vld [vmem:[%s1018_s0 + $0xc8] sm:$0xff]  ;;  %v78_v34 = vpack.c.bf16 %v503_v3, %v388_v31  ;;  %385 = vst [vmem:[%s1019_s1 + $0x84] sm:$0xf] %v68_v29 }
   0x9   :  { %v41_v15 = vld [vmem:[%s1018_s0] sm:$0xff]  ;;  %v39_v17 = vpack.c.bf16 %v503_v3, %v373_v14  ;;  %370 = vst [vmem:[%s1019_s1 + $0xe0] sm:$0xf] %v29_v12  ;;  %v392_v33 = vld [vmem:[%s1018_s0 + $0x8] sm:$0xff]  ;;  %v83_v35 = vpack.c.bf16 %v503_v3, %v390_v32  ;;  %387 = vst [vmem:[%s1019_s1 + $0xe4] sm:$0xf] %v73_v30 }
   0xa   :  { %v43_v18 = vpack.c.bf16 %v503_v3, %v41_v15  ;;  %372 = vst [vmem:[%s1019_s1 + $0x40] sm:$0xf] %v34_v16  ;;  %v88_v36 = vpack.c.bf16 %v503_v3, %v392_v33  ;;  %v400_v43 = vld [vmem:[%s1018_s0 + $0x1d0] sm:$0xff]  ;;  %389 = vst [vmem:[%s1019_s1 + $0x44] sm:$0xf] %v78_v34  ;;  %v412_v55 = vld [vmem:[%s1018_s0 + $0x218] sm:$0xff] }
   0xb   :  { %374 = vst [vmem:[%s1019_s1 + $0xa0] sm:$0xf] %v39_v17  ;;  %v402_v44 = vld [vmem:[%s1018_s0 + $0x110] sm:$0xff]  ;;  %391 = vst [vmem:[%s1019_s1 + $0xa4] sm:$0xf] %v83_v35  ;;  %v108_v46 = vpack.c.bf16 %v503_v3, %v400_v43  ;;  %v414_v56 = vld [vmem:[%s1018_s0 + $0x158] sm:$0xff]  ;;  %v138_v58 = vpack.c.bf16 %v503_v3, %v412_v55 }
   0xc   :  { %375 = vst [vmem:[%s1019_s1 + $0x100] sm:$0xf] %v43_v18  ;;  %v404_v45 = vld [vmem:[%s1018_s0 + $0x50] sm:$0xff]  ;;  %393 = vst [vmem:[%s1019_s1 + $0x104] sm:$0xf] %v88_v36  ;;  %v113_v47 = vpack.c.bf16 %v503_v3, %v402_v44  ;;  %v416_v57 = vld [vmem:[%s1018_s0 + $0x98] sm:$0xff]  ;;  %v143_v59 = vpack.c.bf16 %v503_v3, %v414_v56 }
   0xd   :  { %v118_v48 = vpack.c.bf16 %v503_v3, %v404_v45  ;;  %v406_v49 = vld [vmem:[%s1018_s0 + $0x190] sm:$0xff]  ;;  %395 = vst [vmem:[%s1019_s1 + $0x8] sm:$0xf] %v93_v40  ;;  %397 = vst [vmem:[%s1019_s1 + $0x68] sm:$0xf] %v98_v41  ;;  %v148_v60 = vpack.c.bf16 %v503_v3, %v416_v57  ;;  %v418_v61 = vld [vmem:[%s1018_s0 + $0x1d8] sm:$0xff] }
   0xe   :  { %v408_v50 = vld [vmem:[%s1018_s0 + $0xd0] sm:$0xff]  ;;  %399 = vst [vmem:[%s1019_s1 + $0xc8] sm:$0xf] %v103_v42  ;;  %v123_v52 = vpack.c.bf16 %v503_v3, %v406_v49  ;;  %401 = vst [vmem:[%s1019_s1 + $0x28] sm:$0xf] %v108_v46  ;;  %v420_v62 = vld [vmem:[%s1018_s0 + $0x118] sm:$0xff]  ;;  %v153_v0 = vpack.c.bf16 %v503_v3, %v418_v61 }
   0xf   :  { %v410_v51 = vld [vmem:[%s1018_s0 + $0x10] sm:$0xff]  ;;  %v128_v53 = vpack.c.bf16 %v503_v3, %v408_v50  ;;  %403 = vst [vmem:[%s1019_s1 + $0x88] sm:$0xf] %v113_v47  ;;  %405 = vst [vmem:[%s1019_s1 + $0xe8] sm:$0xf] %v118_v48  ;;  %v422_v63 = vld [vmem:[%s1018_s0 + $0x58] sm:$0xff]  ;;  %v158_v1 = vpack.c.bf16 %v503_v3, %v420_v62 }
  0x10   :  { %v133_v54 = vpack.c.bf16 %v503_v3, %v410_v51  ;;  %407 = vst [vmem:[%s1019_s1 + $0x48] sm:$0xf] %v123_v52  ;;  %v163_v2 = vpack.c.bf16 %v503_v3, %v422_v63  ;;  %v424_v4 = vld [vmem:[%s1018_s0 + $0x198] sm:$0xff]  ;;  %413 = vst [vmem:[%s1019_s1 + $0xc] sm:$0xf] %v138_v58  ;;  %v430_v10 = vld [vmem:[%s1018_s0 + $0x220] sm:$0xff] }
  0x11   :  { %409 = vst [vmem:[%s1019_s1 + $0xa8] sm:$0xf] %v128_v53  ;;  %v426_v5 = vld [vmem:[%s1018_s0 + $0xd8] sm:$0xff]  ;;  %415 = vst [vmem:[%s1019_s1 + $0x6c] sm:$0xf] %v143_v59  ;;  %v168_v7 = vpack.c.bf16 %v503_v3, %v424_v4  ;;  %v432_v11 = vld [vmem:[%s1018_s0 + $0x160] sm:$0xff]  ;;  %v183_v13 = vpack.c.bf16 %v503_v3, %v430_v10 }
  0x12   :  { %411 = vst [vmem:[%s1019_s1 + $0x108] sm:$0xf] %v133_v54  ;;  %v428_v6 = vld [vmem:[%s1018_s0 + $0x18] sm:$0xff]  ;;  %417 = vst [vmem:[%s1019_s1 + $0xcc] sm:$0xf] %v148_v60  ;;  %v173_v8 = vpack.c.bf16 %v503_v3, %v426_v5  ;;  %v434_v12 = vld [vmem:[%s1018_s0 + $0xa0] sm:$0xff]  ;;  %v188_v14 = vpack.c.bf16 %v503_v3, %v432_v11 }
  0x13   :  { %v178_v9 = vpack.c.bf16 %v503_v3, %v428_v6  ;;  %419 = vst [vmem:[%s1019_s1 + $0x2c] sm:$0xf] %v153_v0  ;;  %421 = vst [vmem:[%s1019_s1 + $0x8c] sm:$0xf] %v158_v1  ;;  %v193_v15 = vpack.c.bf16 %v503_v3, %v434_v12  ;;  %v436_v16 = vld [vmem:[%s1018_s0 + $0x1e0] sm:$0xff]  ;;  %v448_v28 = vld [vmem:[%s1018_s0 + $0x228] sm:$0xff] }
  0x14   :  { %423 = vst [vmem:[%s1019_s1 + $0xec] sm:$0xf] %v163_v2  ;;  %v438_v17 = vld [vmem:[%s1018_s0 + $0x120] sm:$0xff]  ;;  %425 = vst [vmem:[%s1019_s1 + $0x4c] sm:$0xf] %v168_v7  ;;  %v198_v19 = vpack.c.bf16 %v503_v3, %v436_v16  ;;  %v450_v29 = vld [vmem:[%s1018_s0 + $0x168] sm:$0xff]  ;;  %v228_v31 = vpack.c.bf16 %v503_v3, %v448_v28 }
  0x15   :  { %v440_v18 = vld [vmem:[%s1018_s0 + $0x60] sm:$0xff]  ;;  %427 = vst [vmem:[%s1019_s1 + $0xac] sm:$0xf] %v173_v8  ;;  %429 = vst [vmem:[%s1019_s1 + $0x10c] sm:$0xf] %v178_v9  ;;  %v203_v20 = vpack.c.bf16 %v503_v3, %v438_v17  ;;  %v452_v30 = vld [vmem:[%s1018_s0 + $0xa8] sm:$0xff]  ;;  %v233_v32 = vpack.c.bf16 %v503_v3, %v450_v29 }
  0x16   :  { %v208_v21 = vpack.c.bf16 %v503_v3, %v440_v18  ;;  %v442_v22 = vld [vmem:[%s1018_s0 + $0x1a0] sm:$0xff]  ;;  %431 = vst [vmem:[%s1019_s1 + $0x10] sm:$0xf] %v183_v13  ;;  %433 = vst [vmem:[%s1019_s1 + $0x70] sm:$0xf] %v188_v14  ;;  %v238_v33 = vpack.c.bf16 %v503_v3, %v452_v30  ;;  %v454_v34 = vld [vmem:[%s1018_s0 + $0x1e8] sm:$0xff] }
  0x17   :  { %v444_v23 = vld [vmem:[%s1018_s0 + $0xe0] sm:$0xff]  ;;  %435 = vst [vmem:[%s1019_s1 + $0xd0] sm:$0xf] %v193_v15  ;;  %v213_v25 = vpack.c.bf16 %v503_v3, %v442_v22  ;;  %437 = vst [vmem:[%s1019_s1 + $0x30] sm:$0xf] %v198_v19  ;;  %v456_v35 = vld [vmem:[%s1018_s0 + $0x128] sm:$0xff]  ;;  %v243_v37 = vpack.c.bf16 %v503_v3, %v454_v34 }
  0x18   :  { %v446_v24 = vld [vmem:[%s1018_s0 + $0x20] sm:$0xff]  ;;  %v218_v26 = vpack.c.bf16 %v503_v3, %v444_v23  ;;  %439 = vst [vmem:[%s1019_s1 + $0x90] sm:$0xf] %v203_v20  ;;  %441 = vst [vmem:[%s1019_s1 + $0xf0] sm:$0xf] %v208_v21  ;;  %v458_v36 = vld [vmem:[%s1018_s0 + $0x68] sm:$0xff]  ;;  %v248_v38 = vpack.c.bf16 %v503_v3, %v456_v35 }
  0x19   :  { %v223_v27 = vpack.c.bf16 %v503_v3, %v446_v24  ;;  %443 = vst [vmem:[%s1019_s1 + $0x50] sm:$0xf] %v213_v25  ;;  %v253_v39 = vpack.c.bf16 %v503_v3, %v458_v36  ;;  %v460_v40 = vld [vmem:[%s1018_s0 + $0x1a8] sm:$0xff]  ;;  %449 = vst [vmem:[%s1019_s1 + $0x14] sm:$0xf] %v228_v31  ;;  %v466_v46 = vld [vmem:[%s1018_s0 + $0x230] sm:$0xff] }
  0x1a   :  { %445 = vst [vmem:[%s1019_s1 + $0xb0] sm:$0xf] %v218_v26  ;;  %v462_v41 = vld [vmem:[%s1018_s0 + $0xe8] sm:$0xff]  ;;  %451 = vst [vmem:[%s1019_s1 + $0x74] sm:$0xf] %v233_v32  ;;  %v258_v43 = vpack.c.bf16 %v503_v3, %v460_v40  ;;  %v468_v47 = vld [vmem:[%s1018_s0 + $0x170] sm:$0xff]  ;;  %v273_v49 = vpack.c.bf16 %v503_v3, %v466_v46 }
  0x1b   :  { %447 = vst [vmem:[%s1019_s1 + $0x110] sm:$0xf] %v223_v27  ;;  %v464_v42 = vld [vmem:[%s1018_s0 + $0x28] sm:$0xff]  ;;  %453 = vst [vmem:[%s1019_s1 + $0xd4] sm:$0xf] %v238_v33  ;;  %v263_v44 = vpack.c.bf16 %v503_v3, %v462_v41  ;;  %v470_v48 = vld [vmem:[%s1018_s0 + $0xb0] sm:$0xff]  ;;  %v278_v50 = vpack.c.bf16 %v503_v3, %v468_v47 }
  0x1c   :  { %v268_v45 = vpack.c.bf16 %v503_v3, %v464_v42  ;;  %455 = vst [vmem:[%s1019_s1 + $0x34] sm:$0xf] %v243_v37  ;;  %457 = vst [vmem:[%s1019_s1 + $0x94] sm:$0xf] %v248_v38  ;;  %v283_v51 = vpack.c.bf16 %v503_v3, %v470_v48  ;;  %v472_v52 = vld [vmem:[%s1018_s0 + $0x1f0] sm:$0xff]  ;;  %v484_v0 = vld [vmem:[%s1018_s0 + $0x238] sm:$0xff] }
  0x1d   :  { %459 = vst [vmem:[%s1019_s1 + $0xf4] sm:$0xf] %v253_v39  ;;  %v474_v53 = vld [vmem:[%s1018_s0 + $0x130] sm:$0xff]  ;;  %461 = vst [vmem:[%s1019_s1 + $0x54] sm:$0xf] %v258_v43  ;;  %v288_v55 = vpack.c.bf16 %v503_v3, %v472_v52  ;;  %v486_v1 = vld [vmem:[%s1018_s0 + $0x178] sm:$0xff]  ;;  %v318_v4 = vpack.c.bf16 %v503_v3, %v484_v0 }
  0x1e   :  { %v476_v54 = vld [vmem:[%s1018_s0 + $0x70] sm:$0xff]  ;;  %463 = vst [vmem:[%s1019_s1 + $0xb4] sm:$0xf] %v263_v44  ;;  %465 = vst [vmem:[%s1019_s1 + $0x114] sm:$0xf] %v268_v45  ;;  %v293_v56 = vpack.c.bf16 %v503_v3, %v474_v53  ;;  %v488_v2 = vld [vmem:[%s1018_s0 + $0xb8] sm:$0xff]  ;;  %v323_v5 = vpack.c.bf16 %v503_v3, %v486_v1 }
  0x1f   :  { %v298_v57 = vpack.c.bf16 %v503_v3, %v476_v54  ;;  %v478_v58 = vld [vmem:[%s1018_s0 + $0x1b0] sm:$0xff]  ;;  %467 = vst [vmem:[%s1019_s1 + $0x18] sm:$0xf] %v273_v49  ;;  %469 = vst [vmem:[%s1019_s1 + $0x78] sm:$0xf] %v278_v50  ;;  %v328_v6 = vpack.c.bf16 %v503_v3, %v488_v2  ;;  %v490_v7 = vld [vmem:[%s1018_s0 + $0x1f8] sm:$0xff] }
  0x20   :  { %v480_v59 = vld [vmem:[%s1018_s0 + $0xf0] sm:$0xff]  ;;  %471 = vst [vmem:[%s1019_s1 + $0xd8] sm:$0xf] %v283_v51  ;;  %v303_v61 = vpack.c.bf16 %v503_v3, %v478_v58  ;;  %473 = vst [vmem:[%s1019_s1 + $0x38] sm:$0xf] %v288_v55  ;;  %v492_v8 = vld [vmem:[%s1018_s0 + $0x138] sm:$0xff]  ;;  %v333_v10 = vpack.c.bf16 %v503_v3, %v490_v7 }
  0x21   :  { %v482_v60 = vld [vmem:[%s1018_s0 + $0x30] sm:$0xff]  ;;  %v308_v62 = vpack.c.bf16 %v503_v3, %v480_v59  ;;  %475 = vst [vmem:[%s1019_s1 + $0x98] sm:$0xf] %v293_v56  ;;  %477 = vst [vmem:[%s1019_s1 + $0xf8] sm:$0xf] %v298_v57  ;;  %v494_v9 = vld [vmem:[%s1018_s0 + $0x78] sm:$0xff]  ;;  %v338_v11 = vpack.c.bf16 %v503_v3, %v492_v8 }
  0x22   :  { %v313_v63 = vpack.c.bf16 %v503_v3, %v482_v60  ;;  %479 = vst [vmem:[%s1019_s1 + $0x58] sm:$0xf] %v303_v61  ;;  %v343_v12 = vpack.c.bf16 %v503_v3, %v494_v9  ;;  %v496_v13 = vld [vmem:[%s1018_s0 + $0x1b8] sm:$0xff]  ;;  %485 = vst [vmem:[%s1019_s1 + $0x1c] sm:$0xf] %v318_v4 }
  0x23   :  { %481 = vst [vmem:[%s1019_s1 + $0xb8] sm:$0xf] %v308_v62  ;;  %v498_v14 = vld [vmem:[%s1018_s0 + $0xf8] sm:$0xff]  ;;  %487 = vst [vmem:[%s1019_s1 + $0x7c] sm:$0xf] %v323_v5  ;;  %v348_v16 = vpack.c.bf16 %v503_v3, %v496_v13 }
  0x24   :  { %483 = vst [vmem:[%s1019_s1 + $0x118] sm:$0xf] %v313_v63  ;;  %v500_v15 = vld [vmem:[%s1018_s0 + $0x38] sm:$0xff]  ;;  %489 = vst [vmem:[%s1019_s1 + $0xdc] sm:$0xf] %v328_v6  ;;  %v353_v17 = vpack.c.bf16 %v503_v3, %v498_v14 }
  0x25   :  { %v358_v3 = vpack.c.bf16 %v503_v3, %v500_v15  ;;  %491 = vst [vmem:[%s1019_s1 + $0x3c] sm:$0xf] %v333_v10  ;;  %493 = vst [vmem:[%s1019_s1 + $0x9c] sm:$0xf] %v338_v11 }
  0x26   :  { %495 = vst [vmem:[%s1019_s1 + $0xfc] sm:$0xf] %v343_v12  ;;  %497 = vst [vmem:[%s1019_s1 + $0x5c] sm:$0xf] %v348_v16 }
  0x27   :  { %499 = vst [vmem:[%s1019_s1 + $0xbc] sm:$0xf] %v353_v17  ;;  %501 = vst [vmem:[%s1019_s1 + $0x11c] sm:$0xf] %v358_v3 }

// kernel: tile.15
= control target key start
LH: loop header
LB: loop body
LE: loop exit
PB: predicated region body
PF: predicated region fallthrough
CT: control target
= control target key end

     0   :  { %s22_s0 = inlined_call_operand.vmem [shape: f32[32], index: 0, kind: input, shape index: {}]   ;;  %s23_s1 = inlined_call_operand.vmem [shape: f32[4,32], index: 1, kind: output, shape index: {}]  }
   0x1   :  { %v4_v0 = vld [vmem:[%s22_s0] ss:$0 sm:$0xff] }
   0x2   :  { %5 = vst [vmem:[%s23_s1] sm:$0xf] %v4_v0 }

// kernel: tile.16
= control target key start
LH: loop header
LB: loop body
LE: loop exit
PB: predicated region body
PF: predicated region fallthrough
CT: control target
= control target key end

     0   :  { %vm7_vm0 = vcmask 261120   ;;  %s37_s8 = smov 32   ;;  %s38_s9 = smov 64   ;;  %vm13_vm1 = vcmask 1048320   ;;  %vm19_vm2 = vcmask 785920   ;;  %vm25_vm3 = vcmask 523520   ;;  %s55_s0 = inlined_call_operand.vmem [shape: f32[4,32], index: 0, kind: input, shape index: {}]   ;;  %s56_s1 = inlined_call_operand.vmem [shape: f32[1,128], index: 1, kind: output, shape index: {}]  }
   0x1   :  { %v4_v0 = vld [vmem:[%s55_s0] sm:$0xf]  ;;  %s36_s0 = smov 96  }
   0x2   :  { %5 = vst [vmem:[#allocation1] sm:$0xf] %v4_v0 }
   0x9   :  { %v10_v1 = vld [vmem:[#allocation1 + $0x3] sm:$0x1]   ;;  %v22_v2 = vld [vmem:[#allocation1 + $0x1] sm:$0x1]   ;;  %v6_v3 = vld [vmem:[#allocation1] sm:$0x1]  }
   0xa   :  { %11 = vrot.lane.b32.xlu0 %v10_v1, %s36_s0  ;;  %23 = vrot.lane.b32.xlu1 %v22_v2, %s37_s8  ;;  %v16_v4 = vld [vmem:[#allocation1 + $0x2] sm:$0x1]   ;;  %8 = vst.msk [vmem:[#allocation0] sm:$0x1] %vm7_vm0, %v6_v3  }
   0xe   :  { %17 = vrot.lane.b32.xlu0 %v16_v4, %s38_s9 }
  0x7c   :  { %v12_v5 = vpop.permute.xlu0 %11   ;;  %v24_v6 = vpop.permute.xlu1 %23  }
  0x7d   :  { %14 = vst.msk [vmem:[#allocation0] sm:$0x1] %vm13_vm1, %v12_v5  }
  0x80   :  { %v18_v7 = vpop.permute.xlu0 %17  }
  0x81   :  { %20 = vst.msk [vmem:[#allocation0] sm:$0x1] %vm19_vm2, %v18_v7  }
  0x82   :  { %26 = vst.msk [vmem:[#allocation0] sm:$0x1] %vm25_vm3, %v24_v6  }
  0x89   :  { %v30_v8 = vld [vmem:[#allocation0] sm:$0x1] }
  0x8a   :  { %32 = vst [vmem:[%s56_s1] sm:$0x1] %v30_v8 }

// kernel: tile.20
= control target key start
LH: loop header
LB: loop body
LE: loop exit
PB: predicated region body
PF: predicated region fallthrough
CT: control target
= control target key end

     0   :  { %s28_s0 = inlined_call_operand.vmem [shape: f32[4], index: 0, kind: input, shape index: {}]   ;;  %s29_s1 = inlined_call_operand.vmem [shape: f32[16,4], index: 1, kind: output, shape index: {}]  }
   0x1   :  { %v4_v0 = vld [vmem:[%s28_s0] ss:$0 sm:$0xff] }
   0x2   :  { %5 = vst [vmem:[%s29_s1] sm:$0xff] %v4_v0  ;;  %8 = vst [vmem:[%s29_s1 + $0x8] sm:$0xff] %v4_v0 }

// kernel: tile.21
= control target key start
LH: loop header
LB: loop body
LE: loop exit
PB: predicated region body
PF: predicated region fallthrough
CT: control target
= control target key end

     0   :  { %s131_s10 = smov 60   ;;  %s132_s11 = smov 52   ;;  %vm3_vm0 = vcmask 31744   ;;  %vm9_vm1 = vcmask 523744   ;;  %vm15_vm2 = vcmask 490944   ;;  %vm21_vm3 = vcmask 458144   ;;  %s207_s0 = inlined_call_operand.vmem [shape: f32[16,4], index: 0, kind: input, shape index: {}]   ;;  %s208_s1 = inlined_call_operand.vmem [shape: f32[1,64], index: 1, kind: output, shape index: {}]  }
   0x1   :  { %v101_v0 = vld [vmem:[%s207_s0 + $0xf] sm:$0x1]   ;;  %v103_v1 = vld [vmem:[%s207_s0 + $0xd] sm:$0x1]   ;;  %v102_v2 = vld [vmem:[%s207_s0 + $0xe] sm:$0x1]  }
   0x2   :  { %7 = vrot.lane.b32.xlu0 %v101_v0, %s131_s10  ;;  %19 = vrot.lane.b32.xlu1 %v103_v1, %s132_s11  ;;  %v104_v3 = vld [vmem:[%s207_s0 + $0xc] sm:$0x1]   ;;  %s133_s16 = smov 56   ;;  %s134_s17 = smov 48   ;;  %v105_v4 = vld [vmem:[%s207_s0 + $0xb] sm:$0x1]  }
   0x3   :  { %v106_v5 = vld [vmem:[%s207_s0 + $0xa] sm:$0x1]   ;;  %v2_v6 = vld [vmem:[%s207_s0] sm:$0x1]   ;;  %s135_s24 = smov 44   ;;  %s136_s25 = smov 40  }
   0x4   :  { %4 = vst.msk [vmem:[#allocation0] sm:$0x1] %vm3_vm0, %v2_v6   ;;  %v107_v7 = vld [vmem:[%s207_s0 + $0x9] sm:$0x1]   ;;  %v108_v8 = vld [vmem:[%s207_s0 + $0x8] sm:$0x1]  }
   0x5   :  { %s137_s30 = smov 36   ;;  %s138_s2 = smov 32   ;;  %v109_v9 = vld [vmem:[%s207_s0 + $0x7] sm:$0x1]   ;;  %v110_v10 = vld [vmem:[%s207_s0 + $0x6] sm:$0x1]  }
   0x6   :  { %13 = vrot.lane.b32.xlu0 %v102_v2, %s133_s16  ;;  %25 = vrot.lane.b32.xlu1 %v104_v3, %s134_s17  ;;  %s139_s7 = smov 28   ;;  %s140_s8 = smov 24   ;;  %v111_v11 = vld [vmem:[%s207_s0 + $0x5] sm:$0x1]   ;;  %v112_v12 = vld [vmem:[%s207_s0 + $0x4] sm:$0x1]  }
   0x7   :  { %s141_s13 = smov 20   ;;  %s142_s14 = smov 16   ;;  %v113_v13 = vld [vmem:[%s207_s0 + $0x3] sm:$0x1]   ;;  %v114_v14 = vld [vmem:[%s207_s0 + $0x2] sm:$0x1]  }
   0x8   :  { %s143_s19 = smov 12   ;;  %s144_s20 = smov 8   ;;  %v115_v15 = vld [vmem:[%s207_s0 + $0x1] sm:$0x1]   ;;  %vm27_vm4 = vcmask 425344   ;;  %vm33_vm5 = vcmask 392544  }
   0x9   :  { %s145_s0 = smov 4   ;;  %vm39_vm6 = vcmask 359744   ;;  %vm45_vm7 = vcmask 326944   ;;  %vm51_vm8 = vcmask 294144   ;;  %vm57_vm9 = vcmask 261344  }
   0xa   :  { %31 = vrot.lane.b32.xlu0 %v105_v4, %s135_s24  ;;  %37 = vrot.lane.b32.xlu1 %v106_v5, %s136_s25  ;;  %vm63_vm10 = vcmask 228544   ;;  %vm69_vm11 = vcmask 195744   ;;  %vm75_vm12 = vcmask 162944   ;;  %vm81_vm13 = vcmask 130144  }
   0xb   :  { %vm87_vm14 = vcmask 97344   ;;  %vm93_vm15 = vcmask 64544  }
   0xe   :  { %43 = vrot.lane.b32.xlu0 %v107_v7, %s137_s30  ;;  %49 = vrot.lane.b32.xlu1 %v108_v8, %s138_s2 }
  0x12   :  { %55 = vrot.lane.b32.xlu0 %v109_v9, %s139_s7  ;;  %61 = vrot.lane.b32.xlu1 %v110_v10, %s140_s8 }
  0x16   :  { %67 = vrot.lane.b32.xlu0 %v111_v11, %s141_s13  ;;  %73 = vrot.lane.b32.xlu1 %v112_v12, %s142_s14 }
  0x1a   :  { %79 = vrot.lane.b32.xlu0 %v113_v13, %s143_s19  ;;  %85 = vrot.lane.b32.xlu1 %v114_v14, %s144_s20 }
  0x1e   :  { %91 = vrot.lane.b32.xlu0 %v115_v15, %s145_s0 }
  0x74   :  { %v8_v16 = vpop.permute.xlu0 %7   ;;  %v20_v17 = vpop.permute.xlu1 %19  }
  0x75   :  { %10 = vst.msk [vmem:[#allocation0] sm:$0x1] %vm9_vm1, %v8_v16  }
  0x78   :  { %v14_v18 = vpop.permute.xlu0 %13   ;;  %v26_v19 = vpop.permute.xlu1 %25  }
  0x79   :  { %16 = vst.msk [vmem:[#allocation0] sm:$0x1] %vm15_vm2, %v14_v18  }
  0x7a   :  { %22 = vst.msk [vmem:[#allocation0] sm:$0x1] %vm21_vm3, %v20_v17  }
  0x7b   :  { %28 = vst.msk [vmem:[#allocation0] sm:$0x1] %vm27_vm4, %v26_v19  }
  0x7c   :  { %v32_v20 = vpop.permute.xlu0 %31   ;;  %v38_v21 = vpop.permute.xlu1 %37  }
  0x7d   :  { %34 = vst.msk [vmem:[#allocation0] sm:$0x1] %vm33_vm5, %v32_v20  }
  0x7e   :  { %40 = vst.msk [vmem:[#allocation0] sm:$0x1] %vm39_vm6, %v38_v21  }
  0x80   :  { %v44_v22 = vpop.permute.xlu0 %43   ;;  %v50_v23 = vpop.permute.xlu1 %49  }
  0x81   :  { %46 = vst.msk [vmem:[#allocation0] sm:$0x1] %vm45_vm7, %v44_v22  }
  0x82   :  { %52 = vst.msk [vmem:[#allocation0] sm:$0x1] %vm51_vm8, %v50_v23  }
  0x84   :  { %v56_v24 = vpop.permute.xlu0 %55   ;;  %v62_v25 = vpop.permute.xlu1 %61  }
  0x85   :  { %58 = vst.msk [vmem:[#allocation0] sm:$0x1] %vm57_vm9, %v56_v24  }
  0x86   :  { %64 = vst.msk [vmem:[#allocation0] sm:$0x1] %vm63_vm10, %v62_v25  }
  0x88   :  { %v68_v26 = vpop.permute.xlu0 %67   ;;  %v74_v27 = vpop.permute.xlu1 %73  }
  0x89   :  { %70 = vst.msk [vmem:[#allocation0] sm:$0x1] %vm69_vm11, %v68_v26  }
  0x8a   :  { %76 = vst.msk [vmem:[#allocation0] sm:$0x1] %vm75_vm12, %v74_v27  }
  0x8c   :  { %v80_v28 = vpop.permute.xlu0 %79   ;;  %v86_v29 = vpop.permute.xlu1 %85  }
  0x8d   :  { %82 = vst.msk [vmem:[#allocation0] sm:$0x1] %vm81_vm13, %v80_v28  }
  0x8e   :  { %88 = vst.msk [vmem:[#allocation0] sm:$0x1] %vm87_vm14, %v86_v29  }
  0x90   :  { %v92_v30 = vpop.permute.xlu0 %91  }
  0x91   :  { %94 = vst.msk [vmem:[#allocation0] sm:$0x1] %vm93_vm15, %v92_v30  }
  0x98   :  { %v98_v31 = vld [vmem:[#allocation0] sm:$0x1] }
  0x99   :  { %100 = vst [vmem:[%s208_s1] sm:$0x1] %v98_v31 }

</bundles_post_ra>
